<compile_context>
chip_gen: v6e
topology: v6e:2x2x1
jax: 0.10.0
libtpu: 0.0.40
codegen_flags: <defaults>
</compile_context>

<pallas_src>
import functools

import jax
import jax.numpy as jnp
from jax import lax
from jax.experimental import pallas as pl
from jax.experimental.pallas import tpu as pltpu

# (vocab_size, embedding_dim) exactly as in the PyTorch nn.ModuleList.
EMB_SPECS = ((6, 3), (7, 4), (12, 6), (7, 4), (96, 50))
NUM_FEATS = len(EMB_SPECS)
TOTAL_VOCAB = sum(v for v, _ in EMB_SPECS)    # 128 == one MXU contraction tile
EMB_TOTAL_DIM = sum(d for _, d in EMB_SPECS)  # 67
ROW_OFFSETS = tuple(sum(v for v, _ in EMB_SPECS[:i]) for i in range(NUM_FEATS))
COL_OFFSETS = tuple(sum(d for _, d in EMB_SPECS[:i]) for i in range(NUM_FEATS))


def _feature_creator_kernel(x_ref, yo_ref, tbl_ref, o_ref, *, dx: int):
    """x_ref: (TB, dx) f32, yo_ref: (TB, 5) i32 vocab-offset indices,
    tbl_ref: (128, OUT_PAD) f32 stacked block-diag table, o_ref: (TB, OUT_PAD) f32."""
    tb = x_ref.shape[0]

    # One multi-hot (TB, 128): a single iota, 5 lane-broadcast compares OR'd.
    iota = lax.broadcasted_iota(jnp.int32, (tb, TOTAL_VOCAB), 1)
    hot = iota == yo_ref[:, 0:1]
    for i in range(1, NUM_FEATS):
        hot = hot | (iota == yo_ref[:, i:i + 1])
    multihot = hot.astype(jnp.float32)

    # Single fused gather: (TB,128) @ (128,OUT_PAD) on the MXU.  The stacked
    # table already positions every embedding at its final column offset, so
    # the result is the full output row with zeros in the first dx columns.
    row = jnp.dot(multihot, tbl_ref[...],
                  preferred_element_type=jnp.float32,
                  precision=lax.Precision.HIGHEST)

    o_ref[...] = row                 # one dense, unmasked 128-lane store
    o_ref[:, 0:dx] = x_ref[...]      # tiny masked store for continuous columns


def nyc_taxi_feature_creator(x, y, tables, *, max_rows_per_block=4096):
    """x: (B, Dx) float32, y: (B, 5) int, tables: 5 embedding tables."""
    b, dx = x.shape
    out_dim = dx + EMB_TOTAL_DIM
    out_pad = pl.cdiv(out_dim, 128) * 128  # lane-dense padded output width

    # Stacked block-diagonal table (128, out_pad), columns pre-shifted by dx.
    stacked = jnp.zeros((TOTAL_VOCAB, out_pad), dtype=jnp.float32)
    for t, (vocab, dim), ro, co in zip(tables, EMB_SPECS, ROW_OFFSETS, COL_OFFSETS):
        stacked = stacked.at[ro:ro + vocab, dx + co:dx + co + dim].set(
            t.astype(jnp.float32))

    # Vocab-offset the categorical indices so one multi-hot covers all 5 features.
    yo = y.astype(jnp.int32) + jnp.asarray(ROW_OFFSETS, dtype=jnp.int32)[None, :]

    # Batch tile: whole batch if small, else a big multiple-of-8 row tile.
    tb = b if b <= max_rows_per_block else (max_rows_per_block // 8) * 8
    grid = (pl.cdiv(b, tb),)

    kernel = functools.partial(_feature_creator_kernel, dx=dx)

    out = pl.pallas_call(
        kernel,
        out_shape=jax.ShapeDtypeStruct((b, out_pad), jnp.float32),
        grid_spec=pltpu.PrefetchScalarGridSpec(
            num_scalar_prefetch=0,
            grid=grid,
            in_specs=[
                pl.BlockSpec((tb, dx), lambda i: (i, 0)),
                pl.BlockSpec((tb, NUM_FEATS), lambda i: (i, 0)),
                # Single fused table, VMEM-resident across the whole grid.
                pl.BlockSpec((TOTAL_VOCAB, out_pad), lambda i: (0, 0)),
            ],
            out_specs=pl.BlockSpec((tb, out_pad), lambda i: (i, 0)),
        ),
        compiler_params=pltpu.CompilerParams(
            dimension_semantics=("parallel",)),
    )(x, yo, stacked)

    # Strip the lane padding (layout plumbing in the wrapper).
    return out[:, :out_dim]


def _reference(x, y, tables):
    outs = [x]
    for i, t in enumerate(tables):
        outs.append(jnp.take(t, y[:, i], axis=0))
    return jnp.concatenate(outs, axis=1)


if __name__ == "__main__":
    key = jax.random.PRNGKey(0)
    k_x, k_y, *k_tabs = jax.random.split(key, 2 + NUM_FEATS)

    B, DX = 8, 5  # NYC-taxi-like: 5 continuous + 5 categorical features
    x = jax.random.normal(k_x, (B, DX), dtype=jnp.float32)

    # Categorical indices, one column per embedding, within each vocab.
    y_cols = []
    for kk, (vocab, _) in zip(k_tabs, EMB_SPECS):
        y_cols.append(jax.random.randint(kk, (B, 1), 0, vocab, dtype=jnp.int32))
    y = jnp.concatenate(y_cols, axis=1)  # (B, 5) int32

    # Deterministic embedding tables (nn.Embedding default init: N(0, 1)).
    tables = []
    for i, (vocab, dim) in enumerate(EMB_SPECS):
        tk = jax.random.fold_in(jax.random.PRNGKey(42), i)
        tables.append(jax.random.normal(tk, (vocab, dim), dtype=jnp.float32))

    out = nyc_taxi_feature_creator(x, y, tables)
    out = jax.block_until_ready(out)

    ref = _reference(x, y, tables)
    assert out.shape == (B, DX + EMB_TOTAL_DIM), out.shape
    assert jnp.allclose(out, ref, atol=1e-5, rtol=1e-5), "mismatch vs reference"

    print("KERNEL_OK")
</pallas_src>

<mosaic_0001>
module attributes {stable_mosaic.version = 11 : i64} {
  func.func @_feature_creator_kernel(%arg0: i32, %arg1: memref<8x5xf32, #tpu.memory_space<vmem>>, %arg2: memref<8x5xi32, #tpu.memory_space<vmem>>, %arg3: memref<128x128xf32, #tpu.memory_space<vmem>>, %arg4: memref<8x128xf32, #tpu.memory_space<vmem>>) attributes {dimension_semantics = [#tpu.dimension_semantics<parallel>], iteration_bounds = array<i64: 1>, scalar_prefetch = 0 : i64, scratch_operands = 0 : i64, tpu.core_type = #tpu.core_type<tc>, window_params = [{transform_indices = @transform_0, window_bounds = array<i64: 8, 5>}, {transform_indices = @transform_1, window_bounds = array<i64: 8, 5>}, {pipeline_mode = #tpu.pipeline_mode<synchronous>, transform_indices = @transform_2, window_bounds = array<i64: 128, 128>}, {transform_indices = @transform_3, window_bounds = array<i64: 8, 128>}]} {
    %0 = tpu.iota {dimensions = array<i32: 1>} : vector<8x128xi32>
    %c0 = arith.constant 0 : index
    %c0_0 = arith.constant 0 : index
    %1 = vector.load %arg2[%c0, %c0_0] : memref<8x5xi32, #tpu.memory_space<vmem>>, vector<8x1xi32>
    %2 = vector.broadcast %1 : vector<8x1xi32> to vector<8x128xi32>
    %3 = arith.cmpi eq, %0, %2 : vector<8x128xi32>
    %c0_1 = arith.constant 0 : index
    %c1 = arith.constant 1 : index
    %4 = vector.load %arg2[%c0_1, %c1] : memref<8x5xi32, #tpu.memory_space<vmem>>, vector<8x1xi32>
    %5 = vector.broadcast %4 : vector<8x1xi32> to vector<8x128xi32>
    %6 = arith.cmpi eq, %0, %5 : vector<8x128xi32>
    %7 = arith.ori %3, %6 : vector<8x128xi1>
    %c0_2 = arith.constant 0 : index
    %c2 = arith.constant 2 : index
    %8 = vector.load %arg2[%c0_2, %c2] : memref<8x5xi32, #tpu.memory_space<vmem>>, vector<8x1xi32>
    %9 = vector.broadcast %8 : vector<8x1xi32> to vector<8x128xi32>
    %10 = arith.cmpi eq, %0, %9 : vector<8x128xi32>
    %11 = arith.ori %7, %10 : vector<8x128xi1>
    %c0_3 = arith.constant 0 : index
    %c3 = arith.constant 3 : index
    %12 = vector.load %arg2[%c0_3, %c3] : memref<8x5xi32, #tpu.memory_space<vmem>>, vector<8x1xi32>
    %13 = vector.broadcast %12 : vector<8x1xi32> to vector<8x128xi32>
    %14 = arith.cmpi eq, %0, %13 : vector<8x128xi32>
    %15 = arith.ori %11, %14 : vector<8x128xi1>
    %c0_4 = arith.constant 0 : index
    %c4 = arith.constant 4 : index
    %16 = vector.load %arg2[%c0_4, %c4] : memref<8x5xi32, #tpu.memory_space<vmem>>, vector<8x1xi32>
    %17 = vector.broadcast %16 : vector<8x1xi32> to vector<8x128xi32>
    %18 = arith.cmpi eq, %0, %17 : vector<8x128xi32>
    %19 = arith.ori %15, %18 : vector<8x128xi1>
    %20 = arith.extui %19 : vector<8x128xi1> to vector<8x128xi32>
    %21 = arith.sitofp %20 : vector<8x128xi32> to vector<8x128xf32>
    %c0_5 = arith.constant 0 : index
    %c0_6 = arith.constant 0 : index
    %22 = vector.load %arg3[%c0_5, %c0_6] : memref<128x128xf32, #tpu.memory_space<vmem>>, vector<128x128xf32>
    %cst = arith.constant dense<0.000000e+00> : vector<8x128xf32>
    %23 = tpu.matmul %21, %22, %cst {dimension_numbers = #tpu.dot_dimension_numbers<[1], [0], [0], [1], [0, 0, 1, 1], [], []>, precision = #tpu.contract_precision<fp32>} : vector<8x128xf32>, vector<128x128xf32>, vector<8x128xf32> -> vector<8x128xf32>
    %c0_7 = arith.constant 0 : index
    %c0_8 = arith.constant 0 : index
    %24 = vector.load %arg4[%c0_7, %c0_8] : memref<8x128xf32, #tpu.memory_space<vmem>>, vector<8x128xf32>
    tpu.vector_store %arg4[%c0_7, %c0_8], %23 {strides = array<i32>} : memref<8x128xf32, #tpu.memory_space<vmem>>, vector<8x128xf32>,
    %c0_9 = arith.constant 0 : index
    %c0_10 = arith.constant 0 : index
    %25 = vector.load %arg1[%c0_9, %c0_10] : memref<8x5xf32, #tpu.memory_space<vmem>>, vector<8x5xf32>
    %c0_11 = arith.constant 0 : index
    %c0_12 = arith.constant 0 : index
    %26 = vector.load %arg4[%c0_11, %c0_12] : memref<8x128xf32, #tpu.memory_space<vmem>>, vector<8x5xf32>
    tpu.vector_store %arg4[%c0_11, %c0_12], %25 {strides = array<i32>} : memref<8x128xf32, #tpu.memory_space<vmem>>, vector<8x5xf32>,
    return
  }
  func.func @transform_0(%arg0: i32) -> (i32, i32) {
    %c0_i32 = arith.constant 0 : i32
    %c0_i32_0 = arith.constant 0 : i32
    return %arg0, %c0_i32 : i32, i32
  }
  func.func @transform_1(%arg0: i32) -> (i32, i32) {
    %c0_i32 = arith.constant 0 : i32
    %c0_i32_0 = arith.constant 0 : i32
    return %arg0, %c0_i32 : i32, i32
  }
  func.func @transform_2(%arg0: i32) -> (i32, i32) {
    %c0_i32 = arith.constant 0 : i32
    %c0_i32_0 = arith.constant 0 : i32
    %c0_i32_1 = arith.constant 0 : i32
    return %c0_i32, %c0_i32_0 : i32, i32
  }
  func.func @transform_3(%arg0: i32) -> (i32, i32) {
    %c0_i32 = arith.constant 0 : i32
    %c0_i32_0 = arith.constant 0 : i32
    return %arg0, %c0_i32 : i32, i32
  }
}

</mosaic_0001>

<bundles_post_ra>
// kernel: tpu_custom_call.1
= control target key start
LH: loop header
LB: loop body
LE: loop exit
PB: predicated region body
PF: predicated region fallthrough
CT: control target
= control target key end

     0   :  { %8 = vsyncpa [#allocation3], 0  ;;  %s1584_s0 = inlined_call_operand.hbm [shape: f32[8,5], index: 0, kind: input, shape index: {}]   ;;  %s1585_s1 = inlined_call_operand.hbm [shape: s32[8,5], index: 1, kind: input, shape index: {}]   ;;  %s1586_s2 = inlined_call_operand.hbm [shape: f32[128,128], index: 2, kind: input, shape index: {}]   ;;  %s1587_s3 = inlined_call_operand.hbm [shape: f32[8,128], index: 3, kind: output, shape index: {}]  }
   0x1   :  { %9 = vsyncpa [#allocation6], 0 }
   0x2   :  { %10 = vsyncpa [#allocation4], 0  ;;  %s1176_s12 = smov [#allocation5]   ;;  %s1177_s14 = smov [#allocation2]  }
   0x3   :  { %s27_s13 = sshll.u32 %s1176_s12, 4  ;;  %s17_s15 = sshll.u32 %s1177_s14, 4  ;;  %s28_s13 = int_to_ptr.vmem [resolvable:$true] %s27_s13  ;;  %s18_s15 = int_to_ptr.vmem [resolvable:$true] %s17_s15 }
   0x4   :  { %s1098_s16 = scalar_lea.vmem %s28_s13, 128  ;;  %p1103_p1 = scmp.lt.s32.totalorder %s28_s13, %s28_s13 }
   0x5   :  { %p1099_p0 = scmp.ne.s32.totalorder %s28_s13, %s1098_s16  ;;  %p1104_p2 = scmp.lt.s32.totalorder %s1098_s16, %s1098_s16 }
   0x7   :  { %p1105_p3 = por %p1104_p2, %p1103_p1 }
   0x9   :  { %p1106_p4 = pnand %p1105_p3, %p1099_p0 }
   0xb   :  { %1109 = shalt.err (!%p1106_p4)
}
   0xc   :  { %30 = dma.hbm_to_vmem [thread:$0]  %s1585_s1, 128, %s28_s13, [#allocation6]  }
   0xd   :  { %s1118_s19 = scalar_lea.vmem %s18_s15, 128  ;;  %p1123_p6 = scmp.lt.s32.totalorder %s18_s15, %s18_s15 }
   0xe   :  { %p1119_p5 = scmp.ne.s32.totalorder %s18_s15, %s1118_s19  ;;  %p1124_p7 = scmp.lt.s32.totalorder %s1118_s19, %s1118_s19 }
  0x10   :  { %p1125_p8 = por %p1124_p7, %p1123_p6 }
  0x12   :  { %p1126_p9 = pnand %p1125_p8, %p1119_p5 }
  0x14   :  { %1129 = shalt.err (!%p1126_p9)
}
  0x15   :  { %20 = dma.hbm_to_vmem [thread:$0]  %s1584_s0, 128, %s18_s15, [#allocation3]  }
  0x16   :  { %s1178_s22 = smov [#allocation7]  }
  0x17   :  { %s36_s23 = sshll.u32 %s1178_s22, 4  ;;  %s37_s23 = int_to_ptr.vmem [resolvable:$true] %s36_s23 }
  0x18   :  { %s1138_s24 = scalar_lea.vmem %s37_s23, 2048  ;;  %p1143_p11 = scmp.lt.s32.totalorder %s37_s23, %s37_s23 }
  0x19   :  { %p1139_p10 = scmp.ne.s32.totalorder %s37_s23, %s1138_s24  ;;  %p1144_p12 = scmp.lt.s32.totalorder %s1138_s24, %s1138_s24 }
  0x1b   :  { %p1145_p13 = por %p1144_p12, %p1143_p11 }
  0x1d   :  { %p1146_p0 = pnand %p1145_p13, %p1139_p10 }
  0x1f   :  { %1149 = shalt.err (!%p1146_p0)
}
  0x20   :  { %s1179_s1 = smov 128   ;;  %s1180_s25 = smov 8  }
  0x21   :  { %42 = dma.hbm_to_vmem [thread:$0]  %s1586_s2, 2048, %s37_s23, [#allocation6], %s1179_s1, %s1179_s1, %s1180_s25  }
  0x22   :  { %1170 = dma.done.wait [#allocation3], 128  }
  0x23   :  { %1171 = vsyncadd [#allocation3], 4294967168 }
  0x24   :  { %1172 = dma.done.wait [#allocation6], 2176  }
  0x25   :  { %1173 = vsyncadd [#allocation6], 4294965120  ;;  %v1181_v0 = vmov 2   ;;  %v1182_v1 = vmov 0   ;;  %v1183_v2 = vmov 0.0   ;;  %v54_v3 = vld [vmem:[#allocation5] sm:$0xff] }
  0x26   :  { %1086 = vset.pattern.permute.xlu1 %v1181_v0  ;;  %1084 = vset.pattern.permute.xlu0 %v1182_v1  ;;  %v96_v4 = vld [vmem:[#allocation7 + $0x78] sm:$0xff]  ;;  %v95_v5 = vld [vmem:[#allocation7 + $0x70] sm:$0xff]  ;;  %v94_v8 = vld [vmem:[#allocation7 + $0x68] sm:$0xff]  ;;  %v1184_v25 = vmov 3   ;;  %v1185_v26 = vmov 1   ;;  %v1186_v45 = vmov 4  }
  0x27   :  { %896 = vmatprep.subr.mxu1 %v1183_v2  ;;  %861 = vmatprep.subr.mxu0 %v1183_v2  ;;  %v1220_v6 = vand.u32 4294901760, %v96_v4  ;;  %v1222_v7 = vand.u32 4294901760, %v95_v5  ;;  %v93_v9 = vld [vmem:[#allocation7 + $0x60] sm:$0xff]  ;;  %v92_v10 = vld [vmem:[#allocation7 + $0x58] sm:$0xff]  ;;  %v1224_v11 = vand.u32 4294901760, %v94_v8  ;;  %v91_v14 = vld [vmem:[#allocation7 + $0x50] sm:$0xff] }
  0x28   :  { %65 = vperm.xlu1 %1086, %v54_v3   ;;  %56 = vperm.xlu0 %1084, %v54_v3   ;;  %v1226_v12 = vand.u32 4294901760, %v93_v9  ;;  %v1228_v13 = vand.u32 4294901760, %v92_v10  ;;  %v90_v15 = vld [vmem:[#allocation7 + $0x48] sm:$0xff]  ;;  %v89_v16 = vld [vmem:[#allocation7 + $0x40] sm:$0xff]  ;;  %v1237_v19 = vand.u32 4294901760, %v91_v14  ;;  %v88_v39 = vld [vmem:[#allocation7 + $0x38] sm:$0xff] }
  0x29   :  { %v1231_v17 = vsub.f32 %v96_v4, %v1220_v6  ;;  %v1234_v18 = vsub.f32 %v95_v5, %v1222_v7  ;;  %862 = vmatpush3.msra.mxu0 %v1220_v6  ;;  %v1239_v20 = vand.u32 4294901760, %v90_v15  ;;  %v1242_v21 = vsub.f32 %v94_v8, %v1224_v11  ;;  %v87_v40 = vld [vmem:[#allocation7 + $0x30] sm:$0xff]  ;;  %v86_v44 = vld [vmem:[#allocation7 + $0x28] sm:$0xff]  ;;  %v85_v47 = vld [vmem:[#allocation7 + $0x20] sm:$0xff]  ;;  %s1188_s0 = smov [#allocation8]  }
  0x2a   :  { %v1245_v22 = vsub.f32 %v93_v9, %v1226_v12  ;;  %v1248_v23 = vsub.f32 %v92_v10, %v1228_v13  ;;  %863 = vmatprep.subr.mxu0 %v1183_v2  ;;  %v1251_v24 = vand.u32 4294901760, %v89_v16  ;;  %v1256_v29 = vsub.f32 %v91_v14, %v1237_v19  ;;  %v84_v55 = vld [vmem:[#allocation7 + $0x18] sm:$0xff]  ;;  %v83_v61 = vld [vmem:[#allocation7 + $0x10] sm:$0xff]  ;;  %v82_v4 = vld [vmem:[#allocation7 + $0x8] sm:$0xff]  ;;  %s748_s2 = sshll.u32 %s1188_s0, 4  ;;  %s749_s2 = int_to_ptr.vmem [resolvable:$true] %s748_s2 }
  0x2b   :  { %v191_v27 = vand.u32 4294901760, %v1231_v17  ;;  %v198_v28 = vand.u32 4294901760, %v1234_v18  ;;  %v205_v30 = vand.u32 4294901760, %v1242_v21  ;;  %v1261_v32 = vsub.f32 %v90_v15, %v1239_v20  ;;  %864 = vmatpush3.msra.mxu0 %v1222_v7  ;;  %v81_v15 = vld [vmem:[#allocation7] sm:$0xff]  ;;  %s1150_s28 = scalar_lea.vmem %s749_s2, 128  ;;  %p1155_p2 = scmp.lt.s32.totalorder %s749_s2, %s749_s2 }
  0x2c   :  { %1087 = vset.pattern.permute.xlu1 %v1184_v25  ;;  %1085 = vset.pattern.permute.xlu0 %v1185_v26  ;;  %v212_v31 = vand.u32 4294901760, %v1245_v22  ;;  %v219_v35 = vand.u32 4294901760, %v1248_v23  ;;  %v226_v37 = vand.u32 4294901760, %v1256_v29  ;;  %v1277_v38 = vsub.f32 %v89_v16, %v1251_v24  ;;  %p1151_p1 = scmp.ne.s32.totalorder %s749_s2, %s1150_s28  ;;  %p1156_p3 = scmp.lt.s32.totalorder %s1150_s28, %s1150_s28 }
  0x2d   :  { %70 = vperm.xlu1 %1087, %v54_v3   ;;  %60 = vperm.xlu0 %1085, %v54_v3   ;;  %v192_v33 = vsub.f32 %v1231_v17, %v191_v27  ;;  %v199_v34 = vsub.f32 %v1234_v18, %v198_v28  ;;  %v206_v36 = vsub.f32 %v1242_v21, %v205_v30  ;;  %v233_v46 = vand.u32 4294901760, %v1261_v32 }
  0x2e   :  { %865 = vmatprep.subr.mxu0 %v1183_v2  ;;  %v213_v43 = vsub.f32 %v1245_v22, %v212_v31  ;;  %v220_v49 = vsub.f32 %v1248_v23, %v219_v35  ;;  %v1289_v50 = vand.u32 4294901760, %v88_v39  ;;  %v1291_v51 = vand.u32 4294901760, %v87_v40  ;;  %p1157_p4 = por %p1156_p3, %p1155_p2 }
  0x2f   :  { %v193_v41 = vand.u32 4294901760, %v192_v33  ;;  %v200_v42 = vand.u32 4294901760, %v199_v34  ;;  %866 = vmatpush3.msra.mxu0 %v1224_v11  ;;  %v207_v48 = vand.u32 4294901760, %v206_v36  ;;  %v227_v52 = vsub.f32 %v1256_v29, %v226_v37 }
  0x30   :  { %867 = vmatprep.subr.mxu0 %v1183_v2  ;;  %v240_v53 = vand.u32 4294901760, %v1277_v38  ;;  %v1299_v54 = vand.u32 4294901760, %v86_v44  ;;  %v214_v56 = vand.u32 4294901760, %v213_v43  ;;  %v1303_v57 = vsub.f32 %v88_v39, %v1289_v50  ;;  %p1158_p5 = pnand %p1157_p4, %p1151_p1 }
  0x31   :  { %1088 = vset.pattern.permute.xlu1 %v1186_v45  ;;  %897 = vmatpush3.msra.mxu1 %v193_v41  ;;  %v1306_v58 = vsub.f32 %v87_v40, %v1291_v51  ;;  %v1308_v59 = vand.u32 4294901760, %v85_v47  ;;  %v234_v60 = vsub.f32 %v1261_v32, %v233_v46  ;;  %v221_v62 = vand.u32 4294901760, %v220_v49 }
  0x32   :  { %75 = vperm.xlu1 %1088, %v54_v3   ;;  %898 = vmatprep.subr.mxu1 %v1183_v2  ;;  %v247_v63 = vand.u32 4294901760, %v1303_v57  ;;  %v1318_v0 = vsub.f32 %v86_v44, %v1299_v54  ;;  %v1320_v1 = vand.u32 4294901760, %v84_v55  ;;  %v241_v3 = vsub.f32 %v1277_v38, %v240_v53 }
  0x33   :  { %868 = vmatpush3.msra.mxu0 %v1226_v12  ;;  %899 = vmatpush3.msra.mxu1 %v200_v42  ;;  %v228_v5 = vand.u32 4294901760, %v227_v52  ;;  %v254_v8 = vand.u32 4294901760, %v1306_v58  ;;  %v1330_v9 = vsub.f32 %v85_v47, %v1308_v59  ;;  %v1332_v10 = vand.u32 4294901760, %v83_v61 }
  0x34   :  { %869 = vmatprep.subr.mxu0 %v1183_v2  ;;  %900 = vmatprep.subr.mxu1 %v1183_v2  ;;  %v235_v14 = vand.u32 4294901760, %v234_v60  ;;  %v248_v16 = vsub.f32 %v1303_v57, %v247_v63  ;;  %v261_v25 = vand.u32 4294901760, %v1318_v0  ;;  %v1342_v26 = vsub.f32 %v84_v55, %v1320_v1 }
  0x35   :  { %870 = vmatpush3.msra.mxu0 %v1228_v13  ;;  %901 = vmatpush3.msra.mxu1 %v207_v48  ;;  %v1344_v33 = vand.u32 4294901760, %v82_v4  ;;  %v242_v34 = vand.u32 4294901760, %v241_v3  ;;  %v255_v36 = vsub.f32 %v1306_v58, %v254_v8  ;;  %v268_v39 = vand.u32 4294901760, %v1330_v9 }
  0x36   :  { %871 = vmatprep.subr.mxu0 %v1183_v2  ;;  %902 = vmatprep.subr.mxu1 %v1183_v2  ;;  %v1354_v40 = vsub.f32 %v83_v61, %v1332_v10  ;;  %v1356_v41 = vand.u32 4294901760, %v81_v15  ;;  %v249_v42 = vand.u32 4294901760, %v248_v16  ;;  %v262_v43 = vsub.f32 %v1318_v0, %v261_v25 }
  0x37   :  { %872 = vmatpush3.msra.mxu0 %v1237_v19  ;;  %903 = vmatpush3.msra.mxu1 %v214_v56  ;;  %v275_v44 = vand.u32 4294901760, %v1342_v26  ;;  %v1366_v47 = vsub.f32 %v82_v4, %v1344_v33  ;;  %v256_v48 = vand.u32 4294901760, %v255_v36  ;;  %v269_v49 = vsub.f32 %v1330_v9, %v268_v39 }
  0x38   :  { %873 = vmatprep.subr.mxu0 %v1183_v2  ;;  %904 = vmatprep.subr.mxu1 %v1183_v2  ;;  %v282_v52 = vand.u32 4294901760, %v1354_v40  ;;  %v1376_v55 = vsub.f32 %v81_v15, %v1356_v41  ;;  %v263_v56 = vand.u32 4294901760, %v262_v43  ;;  %vm1187_vm0 = vmmov 0  }
  0x39   :  { %874 = vmatpush3.msra.mxu0 %v1239_v20  ;;  %905 = vmatpush3.msra.mxu1 %v221_v62  ;;  %v276_v60 = vsub.f32 %v1342_v26, %v275_v44  ;;  %v289_v61 = vand.u32 4294901760, %v1366_v47  ;;  %v270_v62 = vand.u32 4294901760, %v269_v49  ;;  %vm740_vm10 = vcmask 39936  }
  0x3a   :  { %875 = vmatprep.subr.mxu0 %v1183_v2  ;;  %906 = vmatprep.subr.mxu1 %v1183_v2  ;;  %v283_v3 = vsub.f32 %v1354_v40, %v282_v52  ;;  %v296_v4 = vand.u32 4294901760, %v1376_v55 }
  0x3b   :  { %876 = vmatpush3.msra.mxu0 %v1251_v24  ;;  %907 = vmatpush3.msra.mxu1 %v228_v5  ;;  %v277_v5 = vand.u32 4294901760, %v276_v60 }
  0x3c   :  { %877 = vmatprep.subr.mxu0 %v1183_v2  ;;  %908 = vmatprep.subr.mxu1 %v1183_v2  ;;  %v284_v15 = vand.u32 4294901760, %v283_v3  ;;  %v297_v16 = vsub.f32 %v1376_v55, %v296_v4 }
  0x3d   :  { %878 = vmatpush3.msra.mxu0 %v1289_v50  ;;  %909 = vmatpush3.msra.mxu1 %v235_v14  ;;  %v290_v14 = vsub.f32 %v1366_v47, %v289_v61 }
  0x3e   :  { %879 = vmatprep.subr.mxu0 %v1183_v2  ;;  %910 = vmatprep.subr.mxu1 %v1183_v2  ;;  %v298_v36 = vand.u32 4294901760, %v297_v16 }
  0x3f   :  { %880 = vmatpush3.msra.mxu0 %v1291_v51  ;;  %911 = vmatpush3.msra.mxu1 %v242_v34  ;;  %v291_v34 = vand.u32 4294901760, %v290_v14 }
  0x40   :  { %881 = vmatprep.subr.mxu0 %v1183_v2  ;;  %912 = vmatprep.subr.mxu1 %v1183_v2 }
  0x41   :  { %882 = vmatpush3.msra.mxu0 %v1299_v54  ;;  %913 = vmatpush3.msra.mxu1 %v249_v42  ;;  %v52_v42 = vlaneseq }
  0x42   :  { %883 = vmatprep.subr.mxu0 %v1183_v2  ;;  %914 = vmatprep.subr.mxu1 %v1183_v2 }
  0x43   :  { %884 = vmatpush3.msra.mxu0 %v1308_v59  ;;  %915 = vmatpush3.msra.mxu1 %v256_v48  ;;  %v53_v49 = vand.u32 127, %v52_v42 }
  0x44   :  { %885 = vmatprep.subr.mxu0 %v1183_v2  ;;  %916 = vmatprep.subr.mxu1 %v1183_v2 }
  0x45   :  { %928 = vmatprep.mubr.msk.f32.mxu1 %vm1187_vm0, %v1183_v2  ;;  %917 = vmatpush3.msra.mxu1 %v263_v56 }
  0x46   :  { %886 = vmatpush3.msra.mxu0 %v1320_v1  ;;  %918 = vmatprep.subr.mxu1 %v1183_v2 }
  0x47   :  { %887 = vmatprep.subr.mxu0 %v1183_v2  ;;  %919 = vmatpush3.msra.mxu1 %v270_v62 }
  0x48   :  { %888 = vmatpush3.msra.mxu0 %v1332_v10  ;;  %920 = vmatprep.subr.mxu1 %v1183_v2 }
  0x49   :  { %889 = vmatprep.subr.mxu0 %v1183_v2  ;;  %921 = vmatpush3.msra.mxu1 %v277_v5 }
  0x4a   :  { %890 = vmatpush3.msra.mxu0 %v1344_v33  ;;  %922 = vmatprep.subr.mxu1 %v1183_v2 }
  0x4b   :  { %891 = vmatprep.subr.mxu0 %v1183_v2  ;;  %923 = vmatpush3.msra.mxu1 %v284_v15 }
  0x4c   :  { %892 = vmatpush3.msra.mxu0 %v1356_v41  ;;  %924 = vmatprep.subr.mxu1 %v1183_v2 }
  0x4d   :  { %893 = vmatprep.mubr.msk.f32.mxu0 %vm1187_vm0, %v1183_v2  ;;  %925 = vmatpush3.msra.mxu1 %v291_v34 }
  0x4e   :  { %931 = vmatprep.subr.mxu0 %v1183_v2  ;;  %926 = vmatprep.subr.mxu1 %v1183_v2 }
  0x4f   :  { %1089 = vset.pattern.permute.xlu0 %v1186_v45  ;;  %927 = vmatpush3.msra.mxu1 %v298_v36 }
  0x50   :  { %966 = vmatprep.subr.mxu1 %v1183_v2 }
  0xa3   :  { %v66_v43 = vpop.permute.xlu1 %65  ;;  %v57_v48 = vpop.permute.xlu0 %56 }
  0xa4   :  { %vm58_vm1 = vcmp.eq.s32.totalorder %v53_v49, %v57_v48  ;;  %vm67_vm3 = vcmp.eq.s32.totalorder %v53_v49, %v66_v43 }
  0xa8   :  { %v71_v56 = vpop.permute.xlu1 %70  ;;  %v61_v60 = vpop.permute.xlu0 %60 }
  0xa9   :  { %vm62_vm2 = vcmp.eq.s32.totalorder %v53_v49, %v61_v60  ;;  %vm72_vm6 = vcmp.eq.s32.totalorder %v53_v49, %v71_v56 }
  0xaa   :  { %vm63_vm4 = vmor %vm58_vm1, %vm62_vm2 }
  0xab   :  { %vm68_vm5 = vmor %vm63_vm4, %vm67_vm3 }
  0xac   :  { %vm73_vm7 = vmor %vm68_vm5, %vm72_vm6 }
  0xad   :  { %v76_v62 = vpop.permute.xlu1 %75 }
  0xae   :  { %vm77_vm8 = vcmp.eq.s32.totalorder %v53_v49, %v76_v62 }
  0xaf   :  { %vm78_vm9 = vmor %vm73_vm7, %vm77_vm8 }
  0xb0   :  { %v1419_v45 = vsel %vm78_vm9, 1.0, %v1183_v2 }
  0xb1   :  { %v1423_v3 = vsub.f32 %v1419_v45, %v1419_v45  ;;  %929 = vmatmul.mubr.f32.vlgmr.msra.gmra.mxu1 %v1419_v45 }
  0xb2   :  { %967 = vmatpush3.msra.mxu1 %v1220_v6  ;;  %998 = vmatprep.mubr.msk.f32.mxu1 %vm1187_vm0, %v1183_v2 }
  0xb3   :  { %968 = vmatprep.subr.mxu1 %v1183_v2  ;;  %v180_v5 = vand.u32 4294901760, %v1423_v3 }
  0xb4   :  { %969 = vmatpush3.msra.mxu1 %v1222_v7 }
  0xb5   :  { %970 = vmatprep.subr.mxu1 %v1183_v2  ;;  %v181_v14 = vsub.f32 %v1423_v3, %v180_v5 }
  0xb6   :  { %971 = vmatpush3.msra.mxu1 %v1224_v11 }
  0xb7   :  { %972 = vmatprep.subr.mxu1 %v1183_v2  ;;  %v182_v15 = vand.u32 4294901760, %v181_v14 }
  0xb8   :  { %973 = vmatpush3.msra.mxu1 %v1226_v12 }
  0xb9   :  { %974 = vmatprep.subr.mxu1 %v1183_v2  ;;  %894 = vmatmul.mubr.f32.vlgmr.msra.gmra.mxu0 %v182_v15 }
  0xba   :  { %932 = vmatpush3.msra.mxu0 %v1231_v17  ;;  %975 = vmatpush3.msra.mxu1 %v1228_v13 }
  0xbb   :  { %933 = vmatprep.subr.mxu0 %v1183_v2  ;;  %976 = vmatprep.subr.mxu1 %v1183_v2 }
  0xbc   :  { %934 = vmatpush3.msra.mxu0 %v1234_v18  ;;  %977 = vmatpush3.msra.mxu1 %v1237_v19 }
  0xbd   :  { %935 = vmatprep.subr.mxu0 %v1183_v2  ;;  %978 = vmatprep.subr.mxu1 %v1183_v2 }
  0xbe   :  { %936 = vmatpush3.msra.mxu0 %v1242_v21  ;;  %979 = vmatpush3.msra.mxu1 %v1239_v20 }
  0xbf   :  { %937 = vmatprep.subr.mxu0 %v1183_v2  ;;  %980 = vmatprep.subr.mxu1 %v1183_v2 }
  0xc0   :  { %938 = vmatpush3.msra.mxu0 %v1245_v22  ;;  %981 = vmatpush3.msra.mxu1 %v1251_v24 }
  0xc1   :  { %939 = vmatprep.subr.mxu0 %v1183_v2  ;;  %982 = vmatprep.subr.mxu1 %v1183_v2 }
  0xc2   :  { %940 = vmatpush3.msra.mxu0 %v1248_v23  ;;  %983 = vmatpush3.msra.mxu1 %v1289_v50 }
  0xc3   :  { %941 = vmatprep.subr.mxu0 %v1183_v2  ;;  %984 = vmatprep.subr.mxu1 %v1183_v2 }
  0xc4   :  { %942 = vmatpush3.msra.mxu0 %v1256_v29  ;;  %985 = vmatpush3.msra.mxu1 %v1291_v51 }
  0xc5   :  { %943 = vmatprep.subr.mxu0 %v1183_v2  ;;  %986 = vmatprep.subr.mxu1 %v1183_v2 }
  0xc6   :  { %944 = vmatpush3.msra.mxu0 %v1261_v32  ;;  %987 = vmatpush3.msra.mxu1 %v1299_v54 }
  0xc7   :  { %945 = vmatprep.subr.mxu0 %v1183_v2  ;;  %988 = vmatprep.subr.mxu1 %v1183_v2 }
  0xc8   :  { %946 = vmatpush3.msra.mxu0 %v1277_v38  ;;  %989 = vmatpush3.msra.mxu1 %v1308_v59 }
  0xc9   :  { %947 = vmatprep.subr.mxu0 %v1183_v2  ;;  %990 = vmatprep.subr.mxu1 %v1183_v2 }
  0xca   :  { %948 = vmatpush3.msra.mxu0 %v1303_v57  ;;  %991 = vmatpush3.msra.mxu1 %v1320_v1 }
  0xcb   :  { %949 = vmatprep.subr.mxu0 %v1183_v2  ;;  %992 = vmatprep.subr.mxu1 %v1183_v2 }
  0xcc   :  { %950 = vmatpush3.msra.mxu0 %v1306_v58  ;;  %993 = vmatpush3.msra.mxu1 %v1332_v10 }
  0xcd   :  { %951 = vmatprep.subr.mxu0 %v1183_v2  ;;  %994 = vmatprep.subr.mxu1 %v1183_v2 }
  0xce   :  { %952 = vmatpush3.msra.mxu0 %v1318_v0  ;;  %995 = vmatpush3.msra.mxu1 %v1344_v33 }
  0xcf   :  { %953 = vmatprep.subr.mxu0 %v1183_v2  ;;  %996 = vmatprep.subr.mxu1 %v1183_v2 }
  0xd0   :  { %954 = vmatpush3.msra.mxu0 %v1330_v9  ;;  %997 = vmatpush3.msra.mxu1 %v1356_v41 }
  0xd1   :  { %955 = vmatprep.subr.mxu0 %v1183_v2  ;;  %999 = vmatmul.mubr.f32.vlgmr.msra.gmra.mxu1 %v180_v5 }
  0xd2   :  { %1036 = vmatprep.subr.mxu1 %v1183_v2  ;;  %956 = vmatpush3.msra.mxu0 %v1342_v26 }
  0xd3   :  { %1037 = vmatpush3.msra.mxu1 %v1220_v6  ;;  %957 = vmatprep.subr.mxu0 %v1183_v2 }
  0xd4   :  { %1038 = vmatprep.subr.mxu1 %v1183_v2  ;;  %958 = vmatpush3.msra.mxu0 %v1354_v40 }
  0xd5   :  { %1039 = vmatpush3.msra.mxu1 %v1222_v7  ;;  %959 = vmatprep.subr.mxu0 %v1183_v2 }
  0xd6   :  { %1040 = vmatprep.subr.mxu1 %v1183_v2  ;;  %960 = vmatpush3.msra.mxu0 %v1366_v47 }
  0xd7   :  { %1041 = vmatpush3.msra.mxu1 %v1224_v11  ;;  %961 = vmatprep.subr.mxu0 %v1183_v2 }
  0xd8   :  { %1042 = vmatprep.subr.mxu1 %v1183_v2  ;;  %962 = vmatpush3.msra.mxu0 %v1376_v55 }
  0xd9   :  { %963 = vmatprep.mubr.msk.f32.mxu0 %vm1187_vm0, %v1183_v2  ;;  %1043 = vmatpush3.msra.mxu1 %v1226_v12 }
  0xda   :  { %964 = vmatmul.mubr.f32.vlgmr.msra.gmra.mxu0 %v1423_v3  ;;  %1001 = vmatprep.subr.mxu0 %v1183_v2 }
  0xdb   :  { %1044 = vmatprep.subr.mxu1 %v1183_v2  ;;  %1002 = vmatpush3.msra.mxu0 %v191_v27 }
  0xdc   :  { %1045 = vmatpush3.msra.mxu1 %v1228_v13  ;;  %1003 = vmatprep.subr.mxu0 %v1183_v2 }
  0xdd   :  { %1046 = vmatprep.subr.mxu1 %v1183_v2  ;;  %1004 = vmatpush3.msra.mxu0 %v198_v28 }
  0xde   :  { %1047 = vmatpush3.msra.mxu1 %v1237_v19  ;;  %1005 = vmatprep.subr.mxu0 %v1183_v2 }
  0xdf   :  { %1048 = vmatprep.subr.mxu1 %v1183_v2  ;;  %1006 = vmatpush3.msra.mxu0 %v205_v30  ;;  %v739_v30 = vld [vmem:[#allocation2] sm:$0xff] }
  0xe0   :  { %1049 = vmatpush3.msra.mxu1 %v1239_v20  ;;  %1007 = vmatprep.subr.mxu0 %v1183_v2 }
  0xe1   :  { %1050 = vmatprep.subr.mxu1 %v1183_v2  ;;  %1008 = vmatpush3.msra.mxu0 %v212_v31 }
  0xe2   :  { %1051 = vmatpush3.msra.mxu1 %v1251_v24  ;;  %1009 = vmatprep.subr.mxu0 %v1183_v2 }
  0xe3   :  { %1052 = vmatprep.subr.mxu1 %v1183_v2  ;;  %1010 = vmatpush3.msra.mxu0 %v219_v35 }
  0xe4   :  { %1053 = vmatpush3.msra.mxu1 %v1289_v50  ;;  %1011 = vmatprep.subr.mxu0 %v1183_v2 }
  0xe5   :  { %1054 = vmatprep.subr.mxu1 %v1183_v2  ;;  %1012 = vmatpush3.msra.mxu0 %v226_v37 }
  0xe6   :  { %1055 = vmatpush3.msra.mxu1 %v1291_v51  ;;  %1013 = vmatprep.subr.mxu0 %v1183_v2 }
  0xe7   :  { %1056 = vmatprep.subr.mxu1 %v1183_v2  ;;  %1014 = vmatpush3.msra.mxu0 %v233_v46 }
  0xe8   :  { %1057 = vmatpush3.msra.mxu1 %v1299_v54  ;;  %1015 = vmatprep.subr.mxu0 %v1183_v2 }
  0xe9   :  { %1058 = vmatprep.subr.mxu1 %v1183_v2  ;;  %1016 = vmatpush3.msra.mxu0 %v240_v53 }
  0xea   :  { %1059 = vmatpush3.msra.mxu1 %v1308_v59  ;;  %1017 = vmatprep.subr.mxu0 %v1183_v2 }
  0xeb   :  { %1060 = vmatprep.subr.mxu1 %v1183_v2  ;;  %1018 = vmatpush3.msra.mxu0 %v247_v63 }
  0xec   :  { %1061 = vmatpush3.msra.mxu1 %v1320_v1  ;;  %1019 = vmatprep.subr.mxu0 %v1183_v2 }
  0xed   :  { %1062 = vmatprep.subr.mxu1 %v1183_v2  ;;  %1020 = vmatpush3.msra.mxu0 %v254_v8 }
  0xee   :  { %1063 = vmatpush3.msra.mxu1 %v1332_v10  ;;  %1021 = vmatprep.subr.mxu0 %v1183_v2 }
  0xef   :  { %1064 = vmatprep.subr.mxu1 %v1183_v2  ;;  %1022 = vmatpush3.msra.mxu0 %v261_v25 }
  0xf0   :  { %1065 = vmatpush3.msra.mxu1 %v1344_v33  ;;  %1023 = vmatprep.subr.mxu0 %v1183_v2 }
  0xf1   :  { %1066 = vmatprep.subr.mxu1 %v1183_v2  ;;  %1024 = vmatpush3.msra.mxu0 %v268_v39 }
  0xf2   :  { %1067 = vmatpush3.msra.mxu1 %v1356_v41  ;;  %1068 = vmatprep.mubr.msk.f32.mxu1 %vm1187_vm0, %v1183_v2 }
  0xf3   :  { %1025 = vmatprep.subr.mxu0 %v1183_v2  ;;  %1069 = vmatmul.mubr.f32.vlgmr.msra.gmra.mxu1 %v1419_v45 }
  0xf4   :  { %1026 = vmatpush3.msra.mxu0 %v275_v44  ;;  %1033 = vmatprep.mubr.msk.f32.mxu0 %vm1187_vm0, %v1183_v2 }
  0xf5   :  { %1027 = vmatprep.subr.mxu0 %v1183_v2 }
  0xf6   :  { %1028 = vmatpush3.msra.mxu0 %v282_v52 }
  0xf7   :  { %1029 = vmatprep.subr.mxu0 %v1183_v2 }
  0xf8   :  { %1030 = vmatpush3.msra.mxu0 %v289_v61 }
  0xf9   :  { %1031 = vmatprep.subr.mxu0 %v1183_v2 }
  0xfa   :  { %1032 = vmatpush3.msra.mxu0 %v296_v4 }
  0xfb   :  { %1034 = vmatmul.mubr.f32.vlgmr.msra.gmra.mxu0 %v1419_v45 }
 0x171   :  { %v335_v6 = vpop.f32.mrf.mxu1 }
 0x173   :  { %v930_v7 = vpop.f32.mrf.mxu1 }
 0x179   :  { %v184_v11 = vpop.f32.mrf.mxu0 }
 0x17a   :  { %v336_v21 = vadd.f32 %v335_v6, %v184_v11 }
 0x17b   :  { %v895_v12 = vpop.f32.mrf.mxu0 }
 0x191   :  { %v528_v13 = vpop.f32.mrf.mxu1 }
 0x193   :  { %v1000_v17 = vpop.f32.mrf.mxu1 }
 0x19a   :  { %v439_v18 = vpop.f32.mrf.mxu0 }
 0x19b   :  { %v440_v23 = vadd.f32 %v439_v18, %v336_v21 }
 0x19c   :  { %v965_v19 = vpop.f32.mrf.mxu0 }
 0x19d   :  { %v529_v24 = vadd.f32 %v528_v13, %v440_v23 }
 0x1b3   :  { %v734_v20 = vpop.f32.mrf.mxu1 }
 0x1b5   :  { %v1070_v22 = vpop.f32.mrf.mxu1 }
 0x1bb   :  { %v647_v27 = vpop.f32.mrf.mxu0 }
 0x1bc   :  { %v648_v2 = vadd.f32 %v647_v27, %v529_v24 }
 0x1bd   :  { %v1035_v28 = vpop.f32.mrf.mxu0 }
 0x1be   :  { %v735_v29 = vadd.f32 %v734_v20, %v648_v2 }
 0x1c0   :  { %738 = vst [vmem:[#allocation8] sm:$0xff] %v735_v29 }
 0x1c1   :  { %741 = vst.msk [vmem:[#allocation8] sm:$0xff] %vm740_vm10, %v739_v30 }
 0x1c2   :  { %1161 = shalt.err (!%p1158_p5)
}
 0x1c3   :  { %751 = dma.vmem_to_hbm [thread:$0]  %s749_s2, 128, %s1587_s3, [#allocation4]  }
 0x1c4   :  { %1174 = dma.done.wait [#allocation4], 128  }
 0x1c5   :  { %1175 = vsyncadd [#allocation4], 4294967168 }
 0x1c6   :  { %755 = vsyncpa [#allocation3], 1 }
 0x1c7   :  { %756 = vsyncpa [#allocation6], 1 }
 0x1c8   :  { %757 = vsyncpa [#allocation4], 1 }

</bundles_post_ra>
